<compile_context>
chip_gen: v5e
topology: v5e:2x2
jax: 0.10.0
libtpu: 0.0.40
codegen_flags: <defaults>
</compile_context>

<pallas_src>
import functools

import jax
import jax.numpy as jnp
from jax.experimental import pallas as pl
from jax.experimental.pallas import tpu as pltpu


# Conservative across v5e/v6e (128 MiB VMEM) and v7x (64 MiB VMEM, 32 MiB scoped).
_FUSED_VMEM_BUDGET = 24 * 1024 * 1024
_TILE_VMEM_BUDGET = 24 * 1024 * 1024
_VMEM_LIMIT_CAP = 32 * 1024 * 1024


def _vmem_limit(footprint_bytes):
    # Limit sized to the real block footprint + margin, clamped to a value that is
    # safe on every generation (v7x physical VMEM is only 64 MiB).
    return int(min(_VMEM_LIMIT_CAP, max(footprint_bytes + (2 << 20), 16 << 20)))


# ---------------------------------------------------------------------------
# Fused path: one grid step per batch; x is read from HBM exactly once.
# ---------------------------------------------------------------------------
def _fused_kernel(x_ref, w1_ref, b1_ref, w2_ref, b2_ref, o_ref, *, inv_len):
    x = x_ref[0]                                              # (C, L), x.dtype
    pooled = jnp.sum(x.astype(jnp.float32), axis=-1, keepdims=True) * inv_len
    h = jnp.dot(w1_ref[...], pooled,
                preferred_element_type=jnp.float32) + b1_ref[...]
    h = jnp.maximum(h, 0.0)                                   # (C_mid, 1)
    g = jnp.dot(w2_ref[...], h,
                preferred_element_type=jnp.float32) + b2_ref[...]
    g = jax.nn.sigmoid(g)                                     # (C, 1) f32
    # Multiply in the input dtype (bf16-native VPU on v6e/v7x; f32 stays f32).
    o_ref[0] = x * g.astype(x.dtype)


# ---------------------------------------------------------------------------
# Fallback phase 1: per-batch pooled channel sums (tiled + pipelined over L).
# Per-tile work is pure VPU adds into a (C, <=128) accumulator; the cross-lane
# reduce + store happen once per batch in the epilogue.
# ---------------------------------------------------------------------------
def _pool_kernel(x_ref, sum_ref, acc_ref, *, L, TL):
    lt = pl.program_id(1)

    @pl.when(lt == 0)
    def _():
        acc_ref[...] = jnp.zeros_like(acc_ref)

    x = x_ref[0].astype(jnp.float32)                          # (C, TL)
    if L % TL != 0:
        # cdiv grid: zero out the padded lanes of the tail tile.
        lane = jax.lax.broadcasted_iota(jnp.int32, x.shape, 1)
        x = jnp.where(lt * TL + lane < L, x, 0.0)

    acc_w = acc_ref.shape[1]                                  # 128 (or TL if TL < 128)
    part = x[:, 0:acc_w]
    for j in range(1, TL // acc_w):                           # static, lane-aligned slices
        part = part + x[:, j * acc_w:(j + 1) * acc_w]
    acc_ref[...] += part

    @pl.when(lt == pl.num_programs(1) - 1)
    def _():
        sum_ref[0] = jnp.sum(acc_ref[...], axis=-1, keepdims=True)  # (C, 1)


# ---------------------------------------------------------------------------
# Fallback phase 2: out[n, c, l] = x[n, c, l] * gate[n, c].  Multiply in x.dtype.
# ---------------------------------------------------------------------------
def _scale_kernel(x_ref, s_ref, o_ref):
    o_ref[...] = x_ref[...] * s_ref[...]


def _pick_l_tile(L, C, itemsize):
    """Largest lane-dense (multiple-of-128) L tile whose phase-2 footprint
    (x-in + out, each double-buffered) stays within the VMEM budget."""
    if L < 128:
        return L
    best = 128
    for cand in (256, 512, 1024, 2048, 4096):
        if cand <= L and 4 * C * cand * itemsize <= _TILE_VMEM_BUDGET:
            best = cand
    # TODO(synk): if even TL=128 exceeds the budget (enormous C), also tile over C.
    return best


def spatial_weighting(x, w1, b1, w2, b2, *, force_two_phase=False):
    """SpatialWeighting forward pass.

    x : (N, C, L)  in PyTorch NCL layout (no transposes performed).
    w1: (C_mid, C), b1: (C_mid,)   -- Conv1d(kernel_size=1) weights, squeezed.
    w2: (C, C_mid), b2: (C,)
    Returns (N, C, L) in x.dtype.
    """
    N, C, L = x.shape
    C_mid = w1.shape[0]
    itemsize = jnp.dtype(x.dtype).itemsize

    w1f = w1.astype(jnp.float32)
    w2f = w2.astype(jnp.float32)

    # ---- fused single-pass path (preferred) --------------------------------
    fused_fp = (4 * itemsize + 4) * C * L + 4 * (2 * C * C_mid + C_mid + C)
    if not force_two_phase and fused_fp <= _FUSED_VMEM_BUDGET:
        return pl.pallas_call(
            functools.partial(_fused_kernel, inv_len=1.0 / L),
            out_shape=jax.ShapeDtypeStruct((N, C, L), x.dtype),
            grid_spec=pltpu.PrefetchScalarGridSpec(
                num_scalar_prefetch=0,
                grid=(N,),
                in_specs=[
                    pl.BlockSpec((1, C, L), lambda n: (n, 0, 0)),
                    pl.BlockSpec((C_mid, C), lambda n: (0, 0)),
                    pl.BlockSpec((C_mid, 1), lambda n: (0, 0)),
                    pl.BlockSpec((C, C_mid), lambda n: (0, 0)),
                    pl.BlockSpec((C, 1), lambda n: (0, 0)),
                ],
                out_specs=pl.BlockSpec((1, C, L), lambda n: (n, 0, 0)),
            ),
            compiler_params=pltpu.CompilerParams(
                dimension_semantics=("parallel",),
                vmem_limit_bytes=_vmem_limit(fused_fp),
            ),
            cost_estimate=pl.CostEstimate(
                flops=2 * N * (C * L + 2 * C * C_mid) + N * C * L,
                transcendentals=N * C,
                bytes_accessed=2 * N * C * L * itemsize
                + 4 * (2 * C * C_mid + C_mid + C),
            ),
        )(x, w1f,
          b1.reshape(C_mid, 1).astype(jnp.float32),
          w2f,
          b2.reshape(C, 1).astype(jnp.float32))

    # ---- two-phase fallback (big C*L) --------------------------------------
    TL = _pick_l_tile(L, C, itemsize)
    n_lt = pl.cdiv(L, TL)
    acc_w = min(128, TL)

    p1_fp = (2 * itemsize + 4) * C * TL + C * acc_w * 4
    sums = pl.pallas_call(
        functools.partial(_pool_kernel, L=L, TL=TL),
        out_shape=jax.ShapeDtypeStruct((N, C, 1), jnp.float32),
        grid_spec=pltpu.PrefetchScalarGridSpec(
            num_scalar_prefetch=0,
            grid=(N, n_lt),
            in_specs=[pl.BlockSpec((1, C, TL), lambda n, l: (n, 0, l))],
            out_specs=pl.BlockSpec((1, C, 1), lambda n, l: (n, 0, 0)),
            scratch_shapes=[pltpu.VMEM((C, acc_w), jnp.float32)],
        ),
        compiler_params=pltpu.CompilerParams(
            dimension_semantics=("parallel", "arbitrary"),
            vmem_limit_bytes=_vmem_limit(p1_fp),
        ),
        cost_estimate=pl.CostEstimate(
            flops=N * C * L,
            transcendentals=0,
            bytes_accessed=N * C * L * itemsize + N * C * 4,
        ),
    )(x)

    # Tiny gate MLP for all batches at once (hoisted out of the pipelined kernel).
    pooled = sums[:, :, 0] * (1.0 / L)                              # (N, C) f32
    h = jax.nn.relu(pooled @ w1f.T + b1.astype(jnp.float32))        # (N, C_mid)
    g = jax.nn.sigmoid(h @ w2f.T + b2.astype(jnp.float32))          # (N, C)
    gate = g.astype(x.dtype).reshape(N, C, 1)

    p2_fp = 4 * C * TL * itemsize + C * itemsize
    out = pl.pallas_call(
        _scale_kernel,
        out_shape=jax.ShapeDtypeStruct((N, C, L), x.dtype),
        grid_spec=pltpu.PrefetchScalarGridSpec(
            num_scalar_prefetch=0,
            grid=(N, n_lt),
            in_specs=[
                pl.BlockSpec((1, C, TL), lambda n, l: (n, 0, l)),
                pl.BlockSpec((1, C, 1), lambda n, l: (n, 0, 0)),
            ],
            out_specs=pl.BlockSpec((1, C, TL), lambda n, l: (n, 0, l)),
        ),
        compiler_params=pltpu.CompilerParams(
            dimension_semantics=("parallel", "parallel"),
            vmem_limit_bytes=_vmem_limit(p2_fp),
        ),
        cost_estimate=pl.CostEstimate(
            flops=N * C * L,
            transcendentals=0,
            bytes_accessed=2 * N * C * L * itemsize + N * C * itemsize,
        ),
    )(x, gate)

    return out


def _reference(x, w1, b1, w2, b2):
    pooled = jnp.mean(x, axis=2, keepdims=True)                       # (N, C, 1)
    h = jax.nn.relu(jnp.einsum('oc,ncl->nol', w1, pooled) + b1[None, :, None])
    s = jax.nn.sigmoid(jnp.einsum('co,nol->ncl', w2, h) + b2[None, :, None])
    return x * s


if __name__ == "__main__":
    # Small shapes consistent with the module: N=2, channels=4, seq length L=16.
    N, C, L = 2, 4, 16
    ratio = 1
    C_mid = int(C / ratio)

    key = jax.random.PRNGKey(0)
    kx, kw1, kb1, kw2, kb2 = jax.random.split(key, 5)

    x = jax.random.normal(kx, (N, C, L), dtype=jnp.float32)
    # Conv1d weights have shape (out, in, 1) in PyTorch; kernel_size=1 -> squeezed.
    w1 = jax.random.normal(kw1, (C_mid, C), dtype=jnp.float32) * 0.2
    b1 = jax.random.normal(kb1, (C_mid,), dtype=jnp.float32) * 0.1
    w2 = jax.random.normal(kw2, (C, C_mid), dtype=jnp.float32) * 0.2
    b2 = jax.random.normal(kb2, (C,), dtype=jnp.float32) * 0.1

    ref = _reference(x, w1, b1, w2, b2)

    # Fused single-pass path (default for shapes that fit VMEM).
    out = jax.block_until_ready(spatial_weighting(x, w1, b1, w2, b2))
    assert out.shape == (N, C, L)
    assert out.dtype == x.dtype
    assert jnp.allclose(out, ref, atol=1e-5, rtol=1e-5)

    # Also exercise the tiled two-phase fallback path (used for large C*L).
    out2 = jax.block_until_ready(
        spatial_weighting(x, w1, b1, w2, b2, force_two_phase=True))
    assert jnp.allclose(out2, ref, atol=1e-5, rtol=1e-5)

    print("KERNEL_OK")
</pallas_src>

<mosaic_0001>
module attributes {stable_mosaic.version = 11 : i64} {
  func.func @_fused_kernel(%arg0: i32, %arg1: memref<1x4x16xf32, #tpu.memory_space<vmem>>, %arg2: memref<4x4xf32, #tpu.memory_space<vmem>>, %arg3: memref<4x1xf32, #tpu.memory_space<vmem>>, %arg4: memref<4x4xf32, #tpu.memory_space<vmem>>, %arg5: memref<4x1xf32, #tpu.memory_space<vmem>>, %arg6: memref<1x4x16xf32, #tpu.memory_space<vmem>>) attributes {dimension_semantics = [#tpu.dimension_semantics<parallel>], iteration_bounds = array<i64: 2>, scalar_prefetch = 0 : i64, scratch_operands = 0 : i64, tpu.core_type = #tpu.core_type<tc>, window_params = [{transform_indices = @transform_0, window_bounds = array<i64: 1, 4, 16>}, {pipeline_mode = #tpu.pipeline_mode<synchronous>, transform_indices = @transform_1, window_bounds = array<i64: 4, 4>}, {pipeline_mode = #tpu.pipeline_mode<synchronous>, transform_indices = @transform_2, window_bounds = array<i64: 4, 1>}, {pipeline_mode = #tpu.pipeline_mode<synchronous>, transform_indices = @transform_3, window_bounds = array<i64: 4, 4>}, {pipeline_mode = #tpu.pipeline_mode<synchronous>, transform_indices = @transform_4, window_bounds = array<i64: 4, 1>}, {transform_indices = @transform_5, window_bounds = array<i64: 1, 4, 16>}]} {
    %c0 = arith.constant 0 : index
    %c0_0 = arith.constant 0 : index
    %c0_1 = arith.constant 0 : index
    %0 = vector.load %arg1[%c0, %c0_0, %c0_1] : memref<1x4x16xf32, #tpu.memory_space<vmem>>, vector<1x4x16xf32>
    %1 = vector.shape_cast %0 : vector<1x4x16xf32> to vector<4x16xf32>
    %cst = arith.constant dense<0.000000e+00> : vector<4xf32>
    %2 = vector.multi_reduction <add>, %1, %cst [1] : vector<4x16xf32> to vector<4xf32>
    %3 = vector.shape_cast %2 : vector<4xf32> to vector<4x1xf32>
    %cst_2 = arith.constant 6.250000e-02 : f32
    %4 = vector.broadcast %cst_2 : f32 to vector<4x1xf32>
    %5 = arith.mulf %3, %4 : vector<4x1xf32>
    %c0_3 = arith.constant 0 : index
    %c0_4 = arith.constant 0 : index
    %6 = vector.load %arg2[%c0_3, %c0_4] : memref<4x4xf32, #tpu.memory_space<vmem>>, vector<4x4xf32>
    %cst_5 = arith.constant dense<0.000000e+00> : vector<4x1xf32>
    %7 = tpu.matmul %6, %5, %cst_5 {dimension_numbers = #tpu.dot_dimension_numbers<[1], [0], [0], [1], [0, 0, 1, 1], [], []>} : vector<4x4xf32>, vector<4x1xf32>, vector<4x1xf32> -> vector<4x1xf32>
    %c0_6 = arith.constant 0 : index
    %c0_7 = arith.constant 0 : index
    %8 = vector.load %arg3[%c0_6, %c0_7] : memref<4x1xf32, #tpu.memory_space<vmem>>, vector<4x1xf32>
    %9 = arith.addf %7, %8 : vector<4x1xf32>
    %cst_8 = arith.constant 0.000000e+00 : f32
    %10 = vector.broadcast %cst_8 : f32 to vector<4x1xf32>
    %11 = arith.maximumf %9, %10 : vector<4x1xf32>
    %c0_9 = arith.constant 0 : index
    %c0_10 = arith.constant 0 : index
    %12 = vector.load %arg4[%c0_9, %c0_10] : memref<4x4xf32, #tpu.memory_space<vmem>>, vector<4x4xf32>
    %cst_11 = arith.constant dense<0.000000e+00> : vector<4x1xf32>
    %13 = tpu.matmul %12, %11, %cst_11 {dimension_numbers = #tpu.dot_dimension_numbers<[1], [0], [0], [1], [0, 0, 1, 1], [], []>} : vector<4x4xf32>, vector<4x1xf32>, vector<4x1xf32> -> vector<4x1xf32>
    %c0_12 = arith.constant 0 : index
    %c0_13 = arith.constant 0 : index
    %14 = vector.load %arg5[%c0_12, %c0_13] : memref<4x1xf32, #tpu.memory_space<vmem>>, vector<4x1xf32>
    %15 = arith.addf %13, %14 : vector<4x1xf32>
    %16 = arith.negf %15 : vector<4x1xf32>
    %17 = math.exp %16 : vector<4x1xf32>
    %cst_14 = arith.constant 1.000000e+00 : f32
    %18 = vector.broadcast %cst_14 : f32 to vector<4x1xf32>
    %19 = arith.addf %18, %17 : vector<4x1xf32>
    %20 = arith.divf %18, %19 : vector<4x1xf32>
    %21 = vector.broadcast %20 : vector<4x1xf32> to vector<4x16xf32>
    %22 = arith.mulf %1, %21 : vector<4x16xf32>
    %c0_15 = arith.constant 0 : index
    %c0_16 = arith.constant 0 : index
    %c0_17 = arith.constant 0 : index
    %23 = vector.load %arg6[%c0_15, %c0_16, %c0_17] : memref<1x4x16xf32, #tpu.memory_space<vmem>>, vector<1x4x16xf32>
    %24 = vector.shape_cast %23 : vector<1x4x16xf32> to vector<4x16xf32>
    %25 = vector.shape_cast %22 : vector<4x16xf32> to vector<1x4x16xf32>
    tpu.vector_store %arg6[%c0_15, %c0_16, %c0_17], %25 {strides = array<i32>} : memref<1x4x16xf32, #tpu.memory_space<vmem>>, vector<1x4x16xf32>,
    return
  }
  func.func @transform_0(%arg0: i32) -> (i32, i32, i32) {
    %c0_i32 = arith.constant 0 : i32
    %c0_i32_0 = arith.constant 0 : i32
    %c0_i32_1 = arith.constant 0 : i32
    return %arg0, %c0_i32, %c0_i32_0 : i32, i32, i32
  }
  func.func @transform_1(%arg0: i32) -> (i32, i32) {
    %c0_i32 = arith.constant 0 : i32
    %c0_i32_0 = arith.constant 0 : i32
    %c0_i32_1 = arith.constant 0 : i32
    return %c0_i32, %c0_i32_0 : i32, i32
  }
  func.func @transform_2(%arg0: i32) -> (i32, i32) {
    %c0_i32 = arith.constant 0 : i32
    %c0_i32_0 = arith.constant 0 : i32
    %c0_i32_1 = arith.constant 0 : i32
    return %c0_i32, %c0_i32_0 : i32, i32
  }
  func.func @transform_3(%arg0: i32) -> (i32, i32) {
    %c0_i32 = arith.constant 0 : i32
    %c0_i32_0 = arith.constant 0 : i32
    %c0_i32_1 = arith.constant 0 : i32
    return %c0_i32, %c0_i32_0 : i32, i32
  }
  func.func @transform_4(%arg0: i32) -> (i32, i32) {
    %c0_i32 = arith.constant 0 : i32
    %c0_i32_0 = arith.constant 0 : i32
    %c0_i32_1 = arith.constant 0 : i32
    return %c0_i32, %c0_i32_0 : i32, i32
  }
  func.func @transform_5(%arg0: i32) -> (i32, i32, i32) {
    %c0_i32 = arith.constant 0 : i32
    %c0_i32_0 = arith.constant 0 : i32
    %c0_i32_1 = arith.constant 0 : i32
    return %arg0, %c0_i32, %c0_i32_0 : i32, i32, i32
  }
}

</mosaic_0001>

<bundles_post_ra>
// kernel: tpu_custom_call.1
= control target key start
LH: loop header
LB: loop body
LE: loop exit
PB: predicated region body
PF: predicated region fallthrough
CT: control target
= control target key end

     0   :  { %10 = vsyncpa [#allocation3], 0  ;;  %s716_s0 = inlined_call_operand.vmem [shape: f32[2,4,16], index: 0, kind: input, shape index: {}]   ;;  %s717_s1 = inlined_call_operand.hbm [shape: f32[4,4], index: 1, kind: input, shape index: {}]   ;;  %s718_s2 = inlined_call_operand.vmem [shape: f32[4,1], index: 2, kind: input, shape index: {}]   ;;  %s719_s3 = inlined_call_operand.vmem [shape: f32[4,4], index: 3, kind: input, shape index: {}]   ;;  %s720_s4 = inlined_call_operand.vmem [shape: f32[4,1], index: 4, kind: input, shape index: {}]   ;;  %s721_s5 = inlined_call_operand.hbm [shape: f32[2,4,16], index: 5, kind: output, shape index: {}]  }
   0x1   :  { %11 = vsyncpa [#allocation4], 0 }
   0x2   :  { %13 = vsyncpa [#allocation4 + $0x1], 0  ;;  %s616_s18 = smov 0   ;;  %s618_s19 = smov 0  }
   0x3   :  { %s620_s20 = smov 0   ;;  %s622_s21 = smov 0  }
   0x4 LB: > { %s637_s22 = sadd.s32 4294967295, %s582_s21   ;;  %s413_s23 = sadd.s32 4294967294, %s582_s21   ;;  %s582_s21 = sphi %s622_s21, %s727_s21   ;;  %s578_s20 = sphi %s620_s20, %s726_s20   ;;  %s574_s19 = sphi %s618_s19, %s725_s19   ;;  %s570_s18 = sphi %s616_s18, %s724_s18  }
   0x5   : > { %s641_s24 = sadd.s32 1, %s582_s21   ;;  %s136_s25 = sadd.s32 1, %s578_s20 }
   0x6   : > { %s133_s26 = ssub.s32 %s582_s21, %s641_s24  ;;  %p146_p0 = scmp.ne.s32.totalorder %s578_s20, %s574_s19 }
   0x7   : > { %p134_p1 = scmp.eq.s32.totalorder %s133_s26, 0  ;;  %p147_p2 = scmp.eq.s32.totalorder %s637_s22, 1 }
   0x8   : > { %p152_p3 = scmp.ne.s32.totalorder %s574_s19, %s570_s18  ;;  %p153_p4 = scmp.eq.s32.totalorder %s413_s23, 1 }
   0x9   : > { %s652_s27 = scalar_select %p134_p1, %s578_s20, %s136_s25  }
   0xa   : > { %p654_p5 = por %p147_p2, %p146_p0  ;;  %p658_p6 = por %p153_p4, %p152_p3 }
   0xb   : > { %p414_p7 = scmp.ge.s32.totalorder %s582_s21, 1  ;;  %p160_p8 = scmp.lt.s32.totalorder %s582_s21, 3 }
   0xc   : > { %p444_p9 = scmp.eq.s32.totalorder %s637_s22, 0  ;;  %s172_s7 = sshll.u32 %s717_s1, 4  ;;  %s173_s7 = int_to_ptr.hbm [resolvable:$true] %s172_s7 }
   0xd   : > { %p161_p10 = pnand %p414_p7, %p160_p8  ;;  %s584_s8 = smov [#allocation2]  }
   0xe   : > { %s174_s9 = sshll.u32 %s584_s8, 4  ;;  %s175_s9 = int_to_ptr.vmem [resolvable:$true] %s174_s9 }
   0xf   : > { %p436_p11 = pneg %p161_p10  ;;  %203 = sbr.rel (%p161_p10) target bundleno = 555 (0x22b), region = 40 }
  0x11   : > { %p437_p12 = pnand %p444_p9, %p436_p11 }
  0x13   : > { %439 = dma.hbm_to_vmem [thread:$0]  (!%p437_p12), %s173_s7, 64, %s175_s9, [#allocation3]  }
  0x14   : > { %561 = dma.done.wait (%p444_p9), [#allocation3], 64  }
  0x15   : > { %563 = vsyncadd (%p444_p9), [#allocation3], 4294967232  ;;  %p231_p13 = scmp.lt.s32.totalorder %s637_s22, 1  ;;  %vm236_vm0 = vcmask 125952   ;;  %vm247_vm1 = vcmask 1043456   ;;  %vm243_vm2 = vcmask 31744  }
  0x16   : > { %v241_v4 = vld [vmem:[#allocation2] sm:$0xf]  ;;  %v585_v10 = vmov 0   ;;  %s228_s30 = sand.u32 1, %s574_s19   ;;  %s427_s7 = sshll.u32 %s637_s22, 2 }
  0x17   : > { %s232_s10 = scalar_select %p231_p13, %s637_s22, 1  ;;  %v242_v5 = vld [vmem:[%s718_s2] sm:$0xf]  ;;  %481 = vset.pattern.permute.xlu0 %v585_v10 }
  0x18   : > { %v272_v9 = vld [vmem:[%s719_s3] sm:$0xf]  ;;  %s419_s6 = sshll.u32 %s228_s30, 2  ;;  %s536_s23 = scalar_lea.hbm %s721_s5, 8 }
  0x19   : > { %s420_s11 = sshll.u32 %s232_s10, 2  ;;  %v273_v11 = vld [vmem:[%s720_s4] sm:$0xf]  ;;  %s337_s10 = scalar_lea.hbm %s721_s5, %s427_s7 }
  0x1a   : > { %s234_s14 = scalar_lea.vmem %s716_s0, %s420_s11  ;;  %s230_s11 = scalar_lea.vmem [#allocation5], %s419_s6 }
  0x1b   : > { %v235_v0 = vld [vmem:[%s234_s14] sm:$0xf]  ;;  %s339_s12 = sshll.u32 %s230_s11, 4  ;;  %s341_s13 = sshll.u32 %s337_s10, 4  ;;  %s340_s12 = int_to_ptr.vmem [resolvable:$true] %s339_s12  ;;  %s342_s13 = int_to_ptr.hbm [resolvable:$true] %s341_s13 }
  0x1c   : > { %v237_v1 = vsel %vm236_vm0, %v235_v0, 0.0  ;;  %s327_s14 = scalar_lea.sflag [#allocation4], %s228_s30  ;;  %s530_s15 = sshra.s32 %s342_s13, 4  ;;  %s531_s15 = int_to_ptr.hbm [resolvable:$true] %s530_s15 }
  0x1d   : > { %238 = vadd.xlane.f32.xlu0 %v237_v1  ;;  %s532_s16 = scalar_lea.hbm %s531_s15, 4  ;;  %p537_p3 = scmp.lt.s32.totalorder %s531_s15, %s721_s5 }
  0x1e   : > { %p533_p0 = scmp.ne.s32.totalorder %s531_s15, %s532_s16  ;;  %p538_p4 = scmp.lt.s32.totalorder %s536_s23, %s532_s16 }
  0x20   : > { %p534_p1 = pnand %p533_p0, %p654_p5  ;;  %p539_p7 = por %p538_p4, %p537_p3 }
  0x22   : > { %p535_p2 = pneg %p534_p1 }
  0x24   : > { %p540_p8 = pnand %p539_p7, %p535_p2 }
  0x90   : > { %v239_v2 = vpop.xlane.xlu0 %238 }
  0x91   : > { %v240_v3 = vmul.f32 0.0625, %v239_v2 }
  0x93   : > { %421 = vmatpush.msk.msra.mxu0 %vm247_vm1, %v240_v3 }
  0x94   : > { %422 = vmatmul.msk.f32.vlgmr.msra.gmra.mxu0 %vm243_vm2, %v241_v4 }
 0x111   : > { %v268_v6 = vpop.f32.mrf.mxu0 }
 0x112   : > { %v269_v7 = vadd.f32 %v268_v6, %v242_v5 }
 0x114   : > { %v271_v8 = vmax.f32 %v269_v7, 0.0 }
 0x116   : > { %423 = vmatpush.msk.msra.mxu1 %vm247_vm1, %v271_v8 }
 0x117   : > { %424 = vmatmul.msk.f32.vlgmr.msra.gmra.mxu1 %vm243_vm2, %v272_v9 }
 0x194   : > { %v297_v12 = vpop.f32.mrf.mxu1 }
 0x195   : > { %v298_v13 = vadd.f32 %v297_v12, %v273_v11 }
 0x197   : > { %v425_v14 = vmul.f32 -1.442695, %v298_v13 }
 0x199   : > { %482 = vpow2.f32 %v425_v14 }
 0x19f   : > { %v483_v15 = vpop.eup %482 }
 0x1a0   : > { %v303_v16 = vadd.f32 1.0, %v483_v15 }
 0x1a2   : > { %484 = vrcp.f32 %v303_v16  ;;  %v315_v20 = vand.u32 2147483648, %v303_v16  ;;  %v313_v22 = vand.u32 2147483647, %v303_v16  ;;  %vm309_vm4 = vweird.f32 %v303_v16 }
 0x1a4   : > { %v316_v24 = vor.u32 1.1754944e-38, %v315_v20  ;;  %vm314_vm6 = vcmp.eq.f32.partialorder %v313_v22, 8.507059e+37 }
 0x1a8   : > { %v485_v17 = vpop.eup %484 }
 0x1a9   : > { %v305_v18 = vmul.f32 %v485_v17, %v303_v16  ;;  %vm310_vm3 = vweird.f32 %v485_v17 }
 0x1aa   : > { %vm311_vm5 = vmor %vm309_vm4, %vm310_vm3 }
 0x1ab   : > { %v306_v19 = vsub.f32 1.0, %v305_v18 }
 0x1ad   : > { %v307_v21 = vmul.f32 %v485_v17, %v306_v19 }
 0x1af   : > { %v308_v23 = vadd.f32 %v485_v17, %v307_v21 }
 0x1b1   : > { %v312_v25 = vsel %vm311_vm5, %v485_v17, %v308_v23 }
 0x1b2   : > { %v317_v26 = vsel %vm314_vm6, %v316_v24, %v312_v25 }
 0x1b3   : > { %321 = vperm.xlu0 %481, %v317_v26  }
 0x225   : > { %v322_v27 = vpop.permute.xlu0 %321 }
 0x226   : > { %v324_v28 = vmul.f32 %v322_v27, %v235_v0 }
 0x228   : > { %325 = vst.msk [vmem:[%s230_s11] sm:$0xf] %vm236_vm0, %v324_v28 }
 0x229   : > { %543 = shalt.err (!%p540_p8)
}
 0x22a   : > { %434 = dma.vmem_to_hbm [thread:$0]  (%p654_p5), %s340_s12, 64, %s342_s13, %s327_s14  }
 0x22b PF: > { %p446_p9 = scmp.ge.s32.totalorder %s582_s21, 2  ;;  %s353_s30 = sand.u32 1, %s570_s18  }
 0x22c   : > { %s354_s6 = scalar_lea.sflag [#allocation4], %s353_s30 }
 0x22d   : > { %p441_p10 = pnand %p446_p9, %p658_p6 }
 0x22f   : > { %p442_p11 = pneg %p441_p10 }
 0x231   : > { %565 = dma.done.wait (%p442_p11), %s354_s6, 64  }
 0x232   : > { %567 = vsyncadd (%p442_p11), %s354_s6, 4294967232  ;;  %p16_p12 = scmp.ge.s32.totalorder %s641_s24, 4   ;;  %s724_s18 = smov %s574_s19 }
 0x233   : > { %s725_s19 = smov %s578_s20  ;;  %s726_s20 = smov %s652_s27 }
 0x234   : > { %s727_s21 = smov %s641_s24  ;;  %18 = sbr.rel (!%p16_p12) target bundleno = 4 (0x4), region = 80 }
 0x239   :  { %360 = vsyncpa [#allocation3], 1 }
 0x23a   :  { %362 = vsyncpa [#allocation3 + $0x1], 1 }
 0x23b   :  { %363 = vsyncpa [#allocation4], 1 }
 0x23c   :  { %365 = vsyncpa [#allocation4 + $0x1], 1 }

</bundles_post_ra>
